<compile_context>
chip_gen: v7x
topology: tpu7x:2x2x1
jax: 0.10.0
libtpu: 0.0.40
codegen_flags: <defaults>
</compile_context>

<pallas_src>
import math

import jax
import jax.numpy as jnp
from jax.experimental import pallas as pl
from jax.experimental.pallas import tpu as pltpu


def _masklm_kernel(pos_ref, x_ref, w1_ref, b1_ref, gamma_ref, beta_ref,
                   w2_ref, b2_ref, o_ref):
    """One grid step = one block of `block_b` batch elements.

    pos_ref   : (block_b, P, 1) int32   prediction positions
    x_ref     : (block_b, S, D)         hidden states
    w1_ref    : (D, H)   b1_ref: (1, H)
    gamma_ref : (1, H)   beta_ref: (1, H)
    w2_ref    : (H, V)   b2_ref: (1, V)
    o_ref     : (block_b, P, V)
    """
    block_b, num_pred, _ = pos_ref.shape
    seq_len = x_ref.shape[1]
    vocab = w2_ref.shape[1]

    # ---- gather masked_X = X[b, pred_positions[b]] via one-hot matmul (MXU)
    pos = pos_ref[...]                                             # (bb, P, 1)
    seq_ids = jax.lax.broadcasted_iota(
        jnp.int32, (block_b, num_pred, seq_len), 2)                # (bb, P, S)
    onehot = (seq_ids == pos).astype(x_ref.dtype)                  # (bb, P, S)
    gathered = jax.lax.dot_general(
        onehot, x_ref[...],
        dimension_numbers=(((2,), (1,)), ((0,), (0,))),
        preferred_element_type=jnp.float32)                        # (bb, P, D)

    # ---- flatten rows: one big lane-dense matmul per Linear layer
    xg = gathered.reshape(block_b * num_pred, gathered.shape[-1])  # (M, D)

    # ---- Linear 1 + ReLU
    h = jax.lax.dot_general(
        xg.astype(w1_ref.dtype), w1_ref[...],
        dimension_numbers=(((1,), (0,)), ((), ())),
        preferred_element_type=jnp.float32)
    h = jnp.maximum(h + b1_ref[...], 0.0)                          # (M, H)

    # ---- LayerNorm (eps=1e-5, biased variance) with affine gamma/beta
    mu = jnp.mean(h, axis=-1, keepdims=True)
    centered = h - mu
    var = jnp.mean(centered * centered, axis=-1, keepdims=True)
    hn = centered * jax.lax.rsqrt(var + 1e-5)                      # EUP rsqrt
    hn = hn * gamma_ref[...] + beta_ref[...]

    # ---- Linear 2 (vocab projection)
    y = jax.lax.dot_general(
        hn.astype(w2_ref.dtype), w2_ref[...],
        dimension_numbers=(((1,), (0,)), ((), ())),
        preferred_element_type=jnp.float32)
    y = y + b2_ref[...]                                            # (M, V)

    o_ref[...] = y.reshape(block_b, num_pred, vocab).astype(o_ref.dtype)


def _pick_block_b(batch, max_block=8):
    # Amortize the ~0.35 us/step pipeline overhead by processing several batch
    # elements per step, while keeping >=2 grid steps so v7x's two TensorCores
    # both get work.
    target = max(1, min(max_block, batch // 2)) if batch > 1 else 1
    for cand in range(target, 0, -1):
        if batch % cand == 0:
            return cand
    return 1


@jax.jit
def mask_lm_forward(X, pred_positions, W1, b1, gamma, beta, W2, b2):
    """Pallas equivalent of MaskLM.forward."""
    B, S, D = X.shape
    P = pred_positions.shape[1]
    H = W1.shape[1]
    V = W2.shape[1]

    block_b = _pick_block_b(B)
    grid = (B // block_b,)

    pos3 = pred_positions.astype(jnp.int32).reshape(B, P, 1)
    b1_2 = b1.reshape(1, H)
    gamma2 = gamma.reshape(1, H)
    beta2 = beta.reshape(1, H)
    b2_2 = b2.reshape(1, V)

    itemsize = jnp.dtype(X.dtype).itemsize
    bytes_accessed = (B * S * D * itemsize + B * P * 4 +
                      (D * H + 3 * H + H * V + V) * itemsize +
                      B * P * V * itemsize)
    cost = pl.CostEstimate(
        flops=2 * B * P * (S * D + D * H + H * V),
        transcendentals=B * P,                     # one rsqrt per gathered row
        bytes_accessed=bytes_accessed)

    grid_spec = pltpu.PrefetchScalarGridSpec(
        num_scalar_prefetch=0,
        grid=grid,
        in_specs=[
            pl.BlockSpec((block_b, P, 1), lambda i: (i, 0, 0)),   # positions
            pl.BlockSpec((block_b, S, D), lambda i: (i, 0, 0)),   # X
            pl.BlockSpec((D, H), lambda i: (0, 0)),               # W1 (resident)
            pl.BlockSpec((1, H), lambda i: (0, 0)),               # b1
            pl.BlockSpec((1, H), lambda i: (0, 0)),               # gamma
            pl.BlockSpec((1, H), lambda i: (0, 0)),               # beta
            pl.BlockSpec((H, V), lambda i: (0, 0)),               # W2 (resident)
            pl.BlockSpec((1, V), lambda i: (0, 0)),               # b2
        ],
        out_specs=pl.BlockSpec((block_b, P, V), lambda i: (i, 0, 0)),
    )

    return pl.pallas_call(
        _masklm_kernel,
        out_shape=jax.ShapeDtypeStruct((B, P, V), X.dtype),
        grid_spec=grid_spec,
        compiler_params=pltpu.CompilerParams(
            dimension_semantics=("parallel",),
            vmem_limit_bytes=32 * 1024 * 1024),
        cost_estimate=cost,
    )(pos3, X, W1, b1_2, gamma2, beta2, W2, b2_2)


def _reference(X, pred_positions, W1, b1, gamma, beta, W2, b2):
    """Pure-JAX replica of the PyTorch MaskLM.forward, for checking."""
    B, S, D = X.shape
    P = pred_positions.shape[1]
    batch_idx = jnp.repeat(jnp.arange(B), P)
    masked_X = X[batch_idx, pred_positions.reshape(-1)].reshape(B, P, D)
    h = jnp.maximum(masked_X @ W1 + b1, 0.0)
    mu = h.mean(-1, keepdims=True)
    var = ((h - mu) ** 2).mean(-1, keepdims=True)
    hn = (h - mu) / jnp.sqrt(var + 1e-5) * gamma + beta
    return hn @ W2 + b2


if __name__ == "__main__":
    key = jax.random.PRNGKey(0)
    ks = jax.random.split(key, 8)

    # Small but lane-aligned shapes (last dims multiples of 128).
    B, S, P = 2, 16, 8           # batch, sequence length, #masked positions
    D_in, H, V = 256, 256, 512   # input hidden, num_hiddens, vocab size

    X = jax.random.normal(ks[0], (B, S, D_in), dtype=jnp.float32)
    pred_positions = jax.random.randint(ks[1], (B, P), 0, S, dtype=jnp.int32)

    W1 = jax.random.normal(ks[2], (D_in, H), dtype=jnp.float32) / math.sqrt(D_in)
    b1 = 0.1 * jax.random.normal(ks[3], (H,), dtype=jnp.float32)
    gamma = 1.0 + 0.1 * jax.random.normal(ks[4], (H,), dtype=jnp.float32)
    beta = 0.1 * jax.random.normal(ks[5], (H,), dtype=jnp.float32)
    W2 = jax.random.normal(ks[6], (H, V), dtype=jnp.float32) / math.sqrt(H)
    b2 = 0.1 * jax.random.normal(ks[7], (V,), dtype=jnp.float32)

    out = jax.block_until_ready(
        mask_lm_forward(X, pred_positions, W1, b1, gamma, beta, W2, b2))

    ref = _reference(X, pred_positions, W1, b1, gamma, beta, W2, b2)
    assert out.shape == (B, P, V)
    err = float(jnp.max(jnp.abs(out - ref)))
    assert err < 1e-3, f"max abs err {err}"

    print("KERNEL_OK")
</pallas_src>

<mosaic_0001>
module attributes {stable_mosaic.version = 11 : i64} {
  func.func @_masklm_kernel(%arg0: i32, %arg1: memref<1x8x1xi32, #tpu.memory_space<vmem>>, %arg2: memref<1x16x256xf32, #tpu.memory_space<vmem>>, %arg3: memref<256x256xf32, #tpu.memory_space<vmem>>, %arg4: memref<1x256xf32, #tpu.memory_space<vmem>>, %arg5: memref<1x256xf32, #tpu.memory_space<vmem>>, %arg6: memref<1x256xf32, #tpu.memory_space<vmem>>, %arg7: memref<256x512xf32, #tpu.memory_space<vmem>>, %arg8: memref<1x512xf32, #tpu.memory_space<vmem>>, %arg9: memref<1x8x512xf32, #tpu.memory_space<vmem>>) attributes {dimension_semantics = [#tpu.dimension_semantics<parallel>], iteration_bounds = array<i64: 2>, scalar_prefetch = 0 : i64, scratch_operands = 0 : i64, tpu.core_type = #tpu.core_type<tc>, window_params = [{transform_indices = @transform_0, window_bounds = array<i64: 1, 8, 1>}, {transform_indices = @transform_1, window_bounds = array<i64: 1, 16, 256>}, {pipeline_mode = #tpu.pipeline_mode<synchronous>, transform_indices = @transform_2, window_bounds = array<i64: 256, 256>}, {pipeline_mode = #tpu.pipeline_mode<synchronous>, transform_indices = @transform_3, window_bounds = array<i64: 1, 256>}, {pipeline_mode = #tpu.pipeline_mode<synchronous>, transform_indices = @transform_4, window_bounds = array<i64: 1, 256>}, {pipeline_mode = #tpu.pipeline_mode<synchronous>, transform_indices = @transform_5, window_bounds = array<i64: 1, 256>}, {pipeline_mode = #tpu.pipeline_mode<synchronous>, transform_indices = @transform_6, window_bounds = array<i64: 256, 512>}, {pipeline_mode = #tpu.pipeline_mode<synchronous>, transform_indices = @transform_7, window_bounds = array<i64: 1, 512>}, {transform_indices = @transform_8, window_bounds = array<i64: 1, 8, 512>}]} {
    %c0 = arith.constant 0 : index
    %c0_0 = arith.constant 0 : index
    %c0_1 = arith.constant 0 : index
    %0 = vector.load %arg1[%c0, %c0_0, %c0_1] : memref<1x8x1xi32, #tpu.memory_space<vmem>>, vector<1x8x1xi32>
    %1 = tpu.iota {dimensions = array<i32: 2>} : vector<1x8x16xi32>
    %2 = vector.broadcast %0 : vector<1x8x1xi32> to vector<1x8x16xi32>
    %3 = arith.cmpi eq, %1, %2 : vector<1x8x16xi32>
    %4 = arith.extui %3 : vector<1x8x16xi1> to vector<1x8x16xi32>
    %5 = arith.sitofp %4 : vector<1x8x16xi32> to vector<1x8x16xf32>
    %c0_2 = arith.constant 0 : index
    %c0_3 = arith.constant 0 : index
    %c0_4 = arith.constant 0 : index
    %6 = vector.load %arg2[%c0_2, %c0_3, %c0_4] : memref<1x16x256xf32, #tpu.memory_space<vmem>>, vector<1x16x256xf32>
    %cst = arith.constant dense<0.000000e+00> : vector<1x8x256xf32>
    %7 = tpu.matmul %5, %6, %cst {dimension_numbers = #tpu.dot_dimension_numbers<[2], [1], [1], [2], [0, 0, 0, 1, 1, 2], [0], [0]>} : vector<1x8x16xf32>, vector<1x16x256xf32>, vector<1x8x256xf32> -> vector<1x8x256xf32>
    %8 = vector.shape_cast %7 : vector<1x8x256xf32> to vector<8x256xf32>
    %c0_5 = arith.constant 0 : index
    %c0_6 = arith.constant 0 : index
    %9 = vector.load %arg3[%c0_5, %c0_6] : memref<256x256xf32, #tpu.memory_space<vmem>>, vector<256x256xf32>
    %cst_7 = arith.constant dense<0.000000e+00> : vector<8x256xf32>
    %10 = tpu.matmul %8, %9, %cst_7 {dimension_numbers = #tpu.dot_dimension_numbers<[1], [0], [0], [1], [0, 0, 1, 1], [], []>} : vector<8x256xf32>, vector<256x256xf32>, vector<8x256xf32> -> vector<8x256xf32>
    %c0_8 = arith.constant 0 : index
    %c0_9 = arith.constant 0 : index
    %11 = vector.load %arg4[%c0_8, %c0_9] : memref<1x256xf32, #tpu.memory_space<vmem>>, vector<1x256xf32>
    %12 = vector.broadcast %11 : vector<1x256xf32> to vector<8x256xf32>
    %13 = arith.addf %10, %12 : vector<8x256xf32>
    %cst_10 = arith.constant 0.000000e+00 : f32
    %14 = vector.broadcast %cst_10 : f32 to vector<8x256xf32>
    %15 = arith.maximumf %13, %14 : vector<8x256xf32>
    %cst_11 = arith.constant dense<0.000000e+00> : vector<8xf32>
    %16 = vector.multi_reduction <add>, %15, %cst_11 [1] : vector<8x256xf32> to vector<8xf32>
    %17 = vector.shape_cast %16 : vector<8xf32> to vector<8x1xf32>
    %cst_12 = arith.constant 2.560000e+02 : f32
    %18 = vector.broadcast %cst_12 : f32 to vector<8x1xf32>
    %19 = arith.divf %17, %18 : vector<8x1xf32>
    %20 = vector.broadcast %19 : vector<8x1xf32> to vector<8x256xf32>
    %21 = arith.subf %15, %20 : vector<8x256xf32>
    %22 = arith.mulf %21, %21 : vector<8x256xf32>
    %cst_13 = arith.constant dense<0.000000e+00> : vector<8xf32>
    %23 = vector.multi_reduction <add>, %22, %cst_13 [1] : vector<8x256xf32> to vector<8xf32>
    %24 = vector.shape_cast %23 : vector<8xf32> to vector<8x1xf32>
    %cst_14 = arith.constant 2.560000e+02 : f32
    %25 = vector.broadcast %cst_14 : f32 to vector<8x1xf32>
    %26 = arith.divf %24, %25 : vector<8x1xf32>
    %cst_15 = arith.constant 9.99999974E-6 : f32
    %27 = vector.broadcast %cst_15 : f32 to vector<8x1xf32>
    %28 = arith.addf %26, %27 : vector<8x1xf32>
    %29 = math.rsqrt %28 : vector<8x1xf32>
    %30 = vector.broadcast %29 : vector<8x1xf32> to vector<8x256xf32>
    %31 = arith.mulf %21, %30 : vector<8x256xf32>
    %c0_16 = arith.constant 0 : index
    %c0_17 = arith.constant 0 : index
    %32 = vector.load %arg5[%c0_16, %c0_17] : memref<1x256xf32, #tpu.memory_space<vmem>>, vector<1x256xf32>
    %33 = vector.broadcast %32 : vector<1x256xf32> to vector<8x256xf32>
    %34 = arith.mulf %31, %33 : vector<8x256xf32>
    %c0_18 = arith.constant 0 : index
    %c0_19 = arith.constant 0 : index
    %35 = vector.load %arg6[%c0_18, %c0_19] : memref<1x256xf32, #tpu.memory_space<vmem>>, vector<1x256xf32>
    %36 = vector.broadcast %35 : vector<1x256xf32> to vector<8x256xf32>
    %37 = arith.addf %34, %36 : vector<8x256xf32>
    %c0_20 = arith.constant 0 : index
    %c0_21 = arith.constant 0 : index
    %38 = vector.load %arg7[%c0_20, %c0_21] : memref<256x512xf32, #tpu.memory_space<vmem>>, vector<256x512xf32>
    %cst_22 = arith.constant dense<0.000000e+00> : vector<8x512xf32>
    %39 = tpu.matmul %37, %38, %cst_22 {dimension_numbers = #tpu.dot_dimension_numbers<[1], [0], [0], [1], [0, 0, 1, 1], [], []>} : vector<8x256xf32>, vector<256x512xf32>, vector<8x512xf32> -> vector<8x512xf32>
    %c0_23 = arith.constant 0 : index
    %c0_24 = arith.constant 0 : index
    %40 = vector.load %arg8[%c0_23, %c0_24] : memref<1x512xf32, #tpu.memory_space<vmem>>, vector<1x512xf32>
    %41 = vector.broadcast %40 : vector<1x512xf32> to vector<8x512xf32>
    %42 = arith.addf %39, %41 : vector<8x512xf32>
    %43 = vector.shape_cast %42 : vector<8x512xf32> to vector<1x8x512xf32>
    %c0_25 = arith.constant 0 : index
    %c0_26 = arith.constant 0 : index
    %c0_27 = arith.constant 0 : index
    %44 = vector.load %arg9[%c0_25, %c0_26, %c0_27] : memref<1x8x512xf32, #tpu.memory_space<vmem>>, vector<1x8x512xf32>
    tpu.vector_store %arg9[%c0_25, %c0_26, %c0_27], %43 {strides = array<i32>} : memref<1x8x512xf32, #tpu.memory_space<vmem>>, vector<1x8x512xf32>,
    return
  }
  func.func @transform_0(%arg0: i32) -> (i32, i32, i32) {
    %c0_i32 = arith.constant 0 : i32
    %c0_i32_0 = arith.constant 0 : i32
    %c0_i32_1 = arith.constant 0 : i32
    return %arg0, %c0_i32, %c0_i32_0 : i32, i32, i32
  }
  func.func @transform_1(%arg0: i32) -> (i32, i32, i32) {
    %c0_i32 = arith.constant 0 : i32
    %c0_i32_0 = arith.constant 0 : i32
    %c0_i32_1 = arith.constant 0 : i32
    return %arg0, %c0_i32, %c0_i32_0 : i32, i32, i32
  }
  func.func @transform_2(%arg0: i32) -> (i32, i32) {
    %c0_i32 = arith.constant 0 : i32
    %c0_i32_0 = arith.constant 0 : i32
    %c0_i32_1 = arith.constant 0 : i32
    return %c0_i32, %c0_i32_0 : i32, i32
  }
  func.func @transform_3(%arg0: i32) -> (i32, i32) {
    %c0_i32 = arith.constant 0 : i32
    %c0_i32_0 = arith.constant 0 : i32
    %c0_i32_1 = arith.constant 0 : i32
    return %c0_i32, %c0_i32_0 : i32, i32
  }
  func.func @transform_4(%arg0: i32) -> (i32, i32) {
    %c0_i32 = arith.constant 0 : i32
    %c0_i32_0 = arith.constant 0 : i32
    %c0_i32_1 = arith.constant 0 : i32
    return %c0_i32, %c0_i32_0 : i32, i32
  }
  func.func @transform_5(%arg0: i32) -> (i32, i32) {
    %c0_i32 = arith.constant 0 : i32
    %c0_i32_0 = arith.constant 0 : i32
    %c0_i32_1 = arith.constant 0 : i32
    return %c0_i32, %c0_i32_0 : i32, i32
  }
  func.func @transform_6(%arg0: i32) -> (i32, i32) {
    %c0_i32 = arith.constant 0 : i32
    %c0_i32_0 = arith.constant 0 : i32
    %c0_i32_1 = arith.constant 0 : i32
    return %c0_i32, %c0_i32_0 : i32, i32
  }
  func.func @transform_7(%arg0: i32) -> (i32, i32) {
    %c0_i32 = arith.constant 0 : i32
    %c0_i32_0 = arith.constant 0 : i32
    %c0_i32_1 = arith.constant 0 : i32
    return %c0_i32, %c0_i32_0 : i32, i32
  }
  func.func @transform_8(%arg0: i32) -> (i32, i32, i32) {
    %c0_i32 = arith.constant 0 : i32
    %c0_i32_0 = arith.constant 0 : i32
    %c0_i32_1 = arith.constant 0 : i32
    return %arg0, %c0_i32, %c0_i32_0 : i32, i32, i32
  }
}

</mosaic_0001>

<bundles_post_ra>
// kernel: mask_lm_forward.1
= control target key start
LH: loop header
LB: loop body
LE: loop exit
PB: predicated region body
PF: predicated region fallthrough
CT: control target
= control target key end

     0   :  { %13 = vsyncpa [#allocation3], 0  ;;  %s1875_s0 = inlined_call_operand.vmem [shape: s32[2,8,1], index: 0, kind: input, shape index: {}]   ;;  %s1876_s1 = inlined_call_operand.hbm [shape: f32[2,16,256], index: 1, kind: input, shape index: {}]   ;;  %s1877_s2 = inlined_call_operand.hbm [shape: f32[256,256], index: 2, kind: input, shape index: {}]   ;;  %s1878_s3 = inlined_call_operand.vmem [shape: f32[1,256], index: 3, kind: input, shape index: {}]   ;;  %s1879_s4 = inlined_call_operand.vmem [shape: f32[1,256], index: 4, kind: input, shape index: {}]   ;;  %s1880_s5 = inlined_call_operand.vmem [shape: f32[1,256], index: 5, kind: input, shape index: {}]   ;;  %s1881_s6 = inlined_call_operand.hbm [shape: f32[256,512], index: 6, kind: input, shape index: {}]   ;;  %s1882_s7 = inlined_call_operand.vmem [shape: f32[1,512], index: 7, kind: input, shape index: {}]   ;;  %s1883_s8 = inlined_call_operand.hbm [shape: f32[2,8,512], index: 8, kind: output, shape index: {}]  }
   0x1   :  { %15 = vsyncpa [#allocation3 + $0x1], 0 }
   0x2   :  { %16 = vsyncpa [#allocation6], 0 }
   0x3   :  { %17 = vsyncpa [#allocation4], 0 }
   0x4   :  { %19 = vsyncpa [#allocation4 + $0x1], 0  ;;  %s1572_s27 = smov 0   ;;  %s1574_s28 = smov 0  }
   0x5   :  { %s1576_s29 = smov 0   ;;  %s1578_s30 = smov 0  }
   0x6 LB: > { %s1593_s9 = sadd.s32 4294967295, %s1515_s30   ;;  %s1064_s10 = sadd.s32 4294967294, %s1515_s30   ;;  %s1515_s30 = sphi %s1578_s30, %s1907_s30   ;;  %s1511_s29 = sphi %s1576_s29, %s1906_s29   ;;  %s1507_s28 = sphi %s1574_s28, %s1905_s28   ;;  %s1503_s27 = sphi %s1572_s27, %s1904_s27  }
   0x7   : > { %p71_p0 = scmp.ne.s32.totalorder %s1507_s28, %s1503_s27  ;;  %p1884_p1 = scmp.eq.s32.totalorder %s1593_s9, 0 }
   0x8   : > { %p227_p3 = scmp.eq.s32.totalorder %s1064_s10, 1  ;;  %p1065_p5 = scmp.ge.s32.totalorder %s1515_s30, 1 }
   0x9   : > { %p1602_p4 = por %p1884_p1, %p71_p0  ;;  %p234_p7 = scmp.lt.s32.totalorder %s1515_s30, 3 }
   0xa   : > { %p1607_p6 = por %p227_p3, %p71_p0  ;;  %s1517_s14 = smov [#allocation5]  }
   0xb   : > { %s1889_s11 = scalar_select %p1602_p4, 1, 0 }
   0xc   : > { %s1890_s12 = scalar_select %p1607_p6, 1, 0 }
   0xd   : > { %p1612_p8 = pnand %p1065_p5, %p234_p7  ;;  %s246_s15 = sshll.u32 %s1517_s14, 4  ;;  %s1616_s15 = int_to_ptr.vmem [resolvable:$true] %s246_s15 }
   0xe   : > { %s1518_s17 = smov [#allocation7]   ;;  %s1359_s21 = scalar_lea.hbm %s1877_s2, 8192 }
   0xf   : > { %p1295_p9 = pneg %p1612_p8  ;;  %s268_s18 = sshll.u32 %s1518_s17, 4  ;;  %s1627_s18 = int_to_ptr.vmem [resolvable:$true] %s268_s18 }
  0x10   : > { %p1360_p12 = scmp.ne.s32.totalorder %s1877_s2, %s1359_s21  ;;  %p1366_p5 = scmp.lt.u32.totalorder %s1359_s21, %s1877_s2 }
  0x11   : > { %p1623_p11 = pnand %p1295_p9, %p1884_p1 }
  0x13   : > { %p1361_p13 = pneg %p1623_p11 }
  0x15   : > { %p1362_p0 = pnand %p1361_p13, %p1360_p12 }
  0x17   : > { %p1363_p3 = pneg %p1362_p0 }
  0x19   : > { %p1368_p7 = pnand %p1366_p5, %p1363_p3 }
  0x1b   : > { %1371 = shalt.err (!%p1368_p7)
}
  0x1c   : > { %s1372_s26 = scalar_lea.vmem %s1616_s15, 8192  ;;  %p1380_p2 = scmp.lt.s32.totalorder %s1616_s15, %s1616_s15 }
  0x1d   : > { %p1373_p9 = scmp.ne.s32.totalorder %s1616_s15, %s1372_s26  ;;  %p1381_p12 = scmp.lt.s32.totalorder %s1372_s26, %s1372_s26 }
  0x1f   : > { %p1375_p10 = pnand %p1373_p9, %p1361_p13  ;;  %p1382_p0 = por %p1381_p12, %p1380_p2 }
  0x21   : > { %p1376_p1 = pneg %p1375_p10 }
  0x23   : > { %p1383_p6 = pnand %p1382_p0, %p1376_p1 }
  0x25   : > { %1386 = shalt.err (!%p1383_p6)
}
  0x26   : > { %s1885_s10 = smov 256   ;;  %s1886_s14 = smov 16  }
  0x27   : > { %1298 = dma.hbm_to_vmem [thread:$0]  (!%p1623_p11), %s1877_s2, 8192, %s1616_s15, [#allocation6], %s1885_s10, %s1885_s10, %s1886_s14  }
  0x28   : > { %s1387_s22 = scalar_lea.hbm %s1881_s6, 16384 }
  0x29   : > { %p1388_p1 = scmp.ne.s32.totalorder %s1881_s6, %s1387_s22  ;;  %p1394_p10 = scmp.lt.u32.totalorder %s1387_s22, %s1881_s6 }
  0x2b   : > { %p1390_p2 = pnand %p1388_p1, %p1361_p13 }
  0x2d   : > { %p1391_p6 = pneg %p1390_p2 }
  0x2f   : > { %p1396_p3 = pnand %p1394_p10, %p1391_p6 }
  0x31   : > { %1399 = shalt.err (!%p1396_p3)
}
  0x32   : > { %s1400_s15 = scalar_lea.vmem %s1627_s18, 16384  ;;  %p1408_p12 = scmp.lt.s32.totalorder %s1627_s18, %s1627_s18 }
  0x33   : > { %p1401_p5 = scmp.ne.s32.totalorder %s1627_s18, %s1400_s15  ;;  %p1409_p0 = scmp.lt.s32.totalorder %s1400_s15, %s1400_s15 }
  0x35   : > { %p1403_p7 = pnand %p1401_p5, %p1361_p13  ;;  %p1410_p1 = por %p1409_p0, %p1408_p12 }
  0x37   : > { %p1404_p9 = pneg %p1403_p7 }
  0x39   : > { %p1411_p2 = pnand %p1410_p1, %p1404_p9 }
  0x3b   : > { %1414 = shalt.err (!%p1411_p2)
}
  0x3c   : > { %s1521_s17 = smov 512   ;;  %s1522_s19 = smov 32  }
  0x3d   : > { %1301 = dma.hbm_to_vmem [thread:$0]  (!%p1623_p11), %s1881_s6, 16384, %s1627_s18, [#allocation6], %s1521_s17, %s1521_s17, %s1522_s19  }
  0x3e   : > { %s1685_s22 = sadd.s32 1, %s1515_s30   ;;  %s58_s24 = sadd.s32 1, %s1511_s29 }
  0x3f   : > { %s55_s23 = ssub.s32 %s1515_s30, %s1685_s22  ;;  %p65_p6 = scmp.ne.s32.totalorder %s1511_s29, %s1507_s28 }
  0x40   : > { %p56_p13 = scmp.eq.s32.totalorder %s55_s23, 0  ;;  %p66_p10 = scmp.eq.s32.totalorder %s1515_s30, 0 }
  0x41   : > { %p1893_p5 = scmp.eq.s32.totalorder %s1593_s9, 1  ;;  %p1312_p9 = scmp.lt.s32.totalorder %s1515_s30, 2 }
  0x42   : > { %s1694_s25 = scalar_select %p56_p13, %s1511_s29, %s58_s24  }
  0x43   : > { %p67_p3 = por %p66_p10, %p65_p6  ;;  %p1698_p7 = por %p1893_p5, %p65_p6 }
  0x44   : > { %s292_s16 = sand.u32 1, %s1511_s29   ;;  %s1085_s18 = sshll.u32 %s1515_s30, 9 }
  0x45   : > { %s1894_s26 = scalar_select %p1698_p7, 1, 0 }
  0x46   : > { %s1069_s15 = sshll.u32 %s292_s16, 5  ;;  %s1708_s20 = scalar_lea.hbm %s1876_s1, %s1085_s18 }
  0x47   : > { %s296_s21 = scalar_lea.vmem [#allocation2], %s1069_s15  ;;  %p1712_p11 = pnand %p1312_p9, %p67_p3 }
  0x48   : > { %s303_s23 = sshll.u32 %s296_s21, 4  ;;  %s1716_s10 = scalar_lea.sflag [#allocation3], %s292_s16  ;;  %s1710_s23 = int_to_ptr.vmem [resolvable:$true] %s303_s23 }
  0x49   : > { %s1415_s14 = scalar_lea.hbm %s1708_s20, 512  ;;  %p1417_p0 = pneg %p1712_p11 }
  0x4a   : > { %p1416_p12 = scmp.ne.s32.totalorder %s1708_s20, %s1415_s14  ;;  %s1420_s17 = scalar_lea.hbm %s1876_s1, 1024 }
  0x4b   : > { %p1421_p13 = scmp.lt.u32.totalorder %s1708_s20, %s1876_s1  ;;  %p1422_p6 = scmp.lt.u32.totalorder %s1420_s17, %s1415_s14 }
  0x4c   : > { %p1418_p1 = pnand %p1417_p0, %p1416_p12  ;;  %p1424_p3 = scmp.lt.u32.totalorder %s1415_s14, %s1708_s20 }
  0x4d   : > { %p1423_p10 = por %p1422_p6, %p1421_p13 }
  0x4e   : > { %p1419_p2 = pneg %p1418_p1 }
  0x4f   : > { %p1425_p5 = por %p1424_p3, %p1423_p10 }
  0x51   : > { %p1426_p9 = pnand %p1425_p5, %p1419_p2 }
  0x53   : > { %1429 = shalt.err (!%p1426_p9)
}
  0x54   : > { %s1430_s16 = scalar_lea.vmem %s1710_s23, 512  ;;  %s1523_s15 = smov [#allocation2]  }
  0x55   : > { %p1431_p12 = scmp.ne.s32.totalorder %s1710_s23, %s1430_s16  ;;  %s1435_s18 = sshll.u32 %s1523_s15, 4  ;;  %s1436_s18 = int_to_ptr.vmem [resolvable:$false] %s1435_s18 }
  0x56   : > { %s1437_s19 = scalar_lea.vmem %s1436_s18, 1024  ;;  %p1438_p4 = scmp.lt.s32.totalorder %s1710_s23, %s1436_s18 }
  0x57   : > { %p1433_p1 = pnand %p1431_p12, %p1417_p0  ;;  %p1439_p13 = scmp.lt.s32.totalorder %s1437_s19, %s1430_s16 }
  0x59   : > { %p1434_p7 = pneg %p1433_p1  ;;  %p1440_p6 = por %p1439_p13, %p1438_p4 }
  0x5b   : > { %p1441_p10 = pnand %p1440_p6, %p1434_p7 }
  0x5d   : > { %1444 = shalt.err (!%p1441_p10)
}
  0x5e   : > { %s1896_s14 = smov 16   ;;  %s1897_s17 = smov 256  }
  0x5f   : > { %1305 = dma.hbm_to_vmem [thread:$0]  (!%p1712_p11), %s1708_s20, 512, %s1710_s23, %s1716_s10, %s1897_s17, %s1897_s17, %s1896_s14  }
  0x60   : > { %315 = sbr.rel (%p1612_p8) target bundleno = 1220 (0x4c4), region = 52  ;;  %s1750_s21 = sand.u32 (!%p1612_p8), 1, %s1507_s28  }
  0x61   : > { %s1073_s16 = sshll.u32 (!%p1612_p8), %s1750_s21, 5  ;;  %s318_s15 = scalar_lea.sflag (!%p1612_p8), [#allocation3], %s1750_s21 }
  0x62   : > { %s321_s24 = scalar_lea.vmem (!%p1612_p8), [#allocation2], %s1073_s16  ;;  %p1898_p4 = scmp.ne.s32.totalorder (!%p1612_p8), %s1889_s11, 0 }
  0x67   : > { %1490 = dma.done.wait (%p1898_p4), %s318_s15, 512  }
  0x68   : > { %1492 = vsyncadd (%p1898_p4), %s318_s15, 4294966784  ;;  %p1899_p7 = scmp.eq.s32.totalorder %s1593_s9, 0 }
  0x6a   : > { %1494 = dma.done.wait (%p1899_p7), [#allocation6], 24576   ;;  %p1900_p8 = pmov %p1899_p7 }
  0x6b   : > { %p366_p11 = scmp.lt.s32.totalorder %s1593_s9, 1  ;;  %v1524_v0 = vmov 0   ;;  %v380_v2 = vld [vmem:[%s321_s24 + $0x8] sm:$0xff]  ;;  %v382_v3 = vld [vmem:[%s321_s24 + $0x18] sm:$0xff]  ;;  %v379_v5 = vld [vmem:[%s321_s24] sm:$0xff]  ;;  %v1525_v8 = vmov 0.0  }
  0x6c   : > { %1496 = vsyncadd (%p1900_p8), [#allocation6], 4294942720  ;;  %1356 = vset.pattern.permute.xlu0 %v1524_v0  ;;  %v1087_v4 = vpack.c.bf16 %v382_v3, %v380_v2  ;;  %v381_v6 = vld [vmem:[%s321_s24 + $0x10] sm:$0xff]  ;;  %451 = vmatprep.mubr.f32.mxu0 %v1525_v8  ;;  %v459_v9 = vld [vmem:[#allocation5 + $0x8] sm:$0xff]  ;;  %vm383_vm0 = vcmask 130048   ;;  %s1086_s20 = sshll.u32 %s1593_s9, 9 }
  0x6d   : > { %s367_s13 = scalar_select %p366_p11, %s1593_s9, 1  ;;  %v1089_v7 = vpack.c.bf16 %v381_v6, %v379_v5  ;;  %v461_v10 = vld [vmem:[#allocation5 + $0x18] sm:$0xff]  ;;  %v458_v11 = vld [vmem:[#allocation5] sm:$0xff]  ;;  %v460_v13 = vld [vmem:[#allocation5 + $0x10] sm:$0xff] }
  0x6e   : > { %1088 = vmatprep.subr.bf16.mxu0 %v1087_v4  ;;  %v1091_v12 = vpack.c.bf16 %v461_v10, %v459_v9  ;;  %v463_v14 = vld [vmem:[#allocation5 + $0x28] sm:$0xff]  ;;  %v465_v15 = vld [vmem:[#allocation5 + $0x38] sm:$0xff]  ;;  %v1093_v16 = vpack.c.bf16 %v460_v13, %v458_v11  ;;  %v462_v18 = vld [vmem:[#allocation5 + $0x20] sm:$0xff]  ;;  %s365_s23 = scalar_lea.vmem [#allocation8], %s1073_s16  ;;  %s1831_s14 = scalar_lea.hbm %s1883_s8, %s1086_s20 }
  0x6f   : > { %s1077_s10 = sshll.u32 %s367_s13, 3  ;;  %1090 = vmatpush1.bf16.msra.mxu0 %v1089_v7  ;;  %v1095_v17 = vpack.c.bf16 %v465_v15, %v463_v14  ;;  %v464_v19 = vld [vmem:[#allocation5 + $0x30] sm:$0xff]  ;;  %v467_v20 = vld [vmem:[#allocation5 + $0x48] sm:$0xff]  ;;  %v469_v21 = vld [vmem:[#allocation5 + $0x58] sm:$0xff]  ;;  %s949_s9 = scalar_lea.sflag [#allocation4], %s1750_s21 }
  0x70   : > { %s369_s18 = scalar_lea.vmem %s1875_s0, %s1077_s10  ;;  %1092 = vmatprep.subr.bf16.mxu1 %v1091_v12  ;;  %v1097_v22 = vpack.c.bf16 %v464_v19, %v462_v18  ;;  %v1099_v23 = vpack.c.bf16 %v469_v21, %v467_v20  ;;  %v466_v24 = vld [vmem:[#allocation5 + $0x40] sm:$0xff]  ;;  %v468_v25 = vld [vmem:[#allocation5 + $0x50] sm:$0xff]  ;;  %v471_v26 = vld [vmem:[#allocation5 + $0x68] sm:$0xff]  ;;  %p1901_p2 = scmp.ne.s32.totalorder %s1894_s26, 0 }
  0x71   : > { %v370_v1 = vld [vmem:[%s369_s18] sm:$0xff]  ;;  %1094 = vmatpush1.bf16.msra.mxu1 %v1093_v16  ;;  %v473_v27 = vld [vmem:[#allocation5 + $0x78] sm:$0xff]  ;;  %v1101_v28 = vpack.c.bf16 %v468_v25, %v466_v24  ;;  %v472_v31 = vld [vmem:[#allocation5 + $0x70] sm:$0xff]  ;;  %s963_s18 = sshll.u32 %s365_s23, 4  ;;  %s1526_s17 = smov [#allocation8]   ;;  %s1833_s18 = int_to_ptr.vmem [resolvable:$true] %s963_s18 }
  0x72   : > { %374 = vperm.xlu0 %1356, %v370_v1   ;;  %1096 = vmatprep.subr.bf16.mxu1 %v1095_v17  ;;  %v1103_v29 = vpack.c.bf16 %v473_v27, %v471_v26  ;;  %v470_v30 = vld [vmem:[#allocation5 + $0x60] sm:$0xff]  ;;  %v475_v32 = vld [vmem:[#allocation5 + $0x88] sm:$0xff]  ;;  %v477_v33 = vld [vmem:[#allocation5 + $0x98] sm:$0xff]  ;;  %s1445_s16 = scalar_lea.vmem %s1833_s18, 512  ;;  %s1449_s15 = sshll.u32 %s1526_s17, 4  ;;  %s1450_s15 = int_to_ptr.vmem [resolvable:$false] %s1449_s15 }
  0x73   : > { %v1105_v34 = vpack.c.bf16 %v472_v31, %v470_v30  ;;  %v1107_v35 = vpack.c.bf16 %v477_v33, %v475_v32  ;;  %v474_v36 = vld [vmem:[#allocation5 + $0x80] sm:$0xff]  ;;  %v476_v37 = vld [vmem:[#allocation5 + $0x90] sm:$0xff]  ;;  %v479_v38 = vld [vmem:[#allocation5 + $0xa8] sm:$0xff]  ;;  %p1446_p0 = scmp.ne.s32.totalorder %s1833_s18, %s1445_s16  ;;  %s1451_s24 = scalar_lea.vmem %s1450_s15, 1024 }
  0x74   : > { %v481_v39 = vld [vmem:[#allocation5 + $0xb8] sm:$0xff]  ;;  %v1109_v40 = vpack.c.bf16 %v476_v37, %v474_v36  ;;  %v478_v42 = vld [vmem:[#allocation5 + $0xa0] sm:$0xff]  ;;  %v480_v43 = vld [vmem:[#allocation5 + $0xb0] sm:$0xff]  ;;  %p1452_p9 = scmp.lt.s32.totalorder %s1833_s18, %s1450_s15  ;;  %p1453_p12 = scmp.lt.s32.totalorder %s1451_s24, %s1445_s16 }
  0x75   : > { %1098 = vmatpush1.bf16.msra.mxu1 %v1097_v22  ;;  %v1111_v41 = vpack.c.bf16 %v481_v39, %v479_v38  ;;  %v483_v44 = vld [vmem:[#allocation5 + $0xc8] sm:$0xff]  ;;  %v485_v45 = vld [vmem:[#allocation5 + $0xd8] sm:$0xff]  ;;  %v1113_v46 = vpack.c.bf16 %v480_v43, %v478_v42  ;;  %v482_v48 = vld [vmem:[#allocation5 + $0xc0] sm:$0xff]  ;;  %v371_v39 = vlaneseq  ;;  %p1447_p3 = pnand %p1446_p0, %p1901_p2 }
  0x76   : > { %1100 = vmatprep.subr.bf16.mxu1 %v1099_v23  ;;  %v1115_v47 = vpack.c.bf16 %v485_v45, %v483_v44  ;;  %v484_v49 = vld [vmem:[#allocation5 + $0xd0] sm:$0xff]  ;;  %v487_v50 = vld [vmem:[#allocation5 + $0xe8] sm:$0xff]  ;;  %v489_v51 = vld [vmem:[#allocation5 + $0xf8] sm:$0xff]  ;;  %p1454_p1 = por %p1453_p12, %p1452_p9 }
  0x77   : > { %v1117_v52 = vpack.c.bf16 %v484_v49, %v482_v48  ;;  %v1119_v53 = vpack.c.bf16 %v489_v51, %v487_v50  ;;  %v486_v54 = vld [vmem:[#allocation5 + $0xe0] sm:$0xff]  ;;  %v488_v55 = vld [vmem:[#allocation5 + $0xf0] sm:$0xff]  ;;  %v491_v56 = vld [vmem:[#allocation5 + $0x108] sm:$0xff]  ;;  %v1771_v48 = vshrl.u32 %v371_v39, 7  ;;  %p1448_p5 = pneg %p1447_p3 }
  0x78   : > { %v493_v57 = vld [vmem:[#allocation5 + $0x118] sm:$0xff]  ;;  %v1121_v58 = vpack.c.bf16 %v488_v55, %v486_v54  ;;  %v490_v60 = vld [vmem:[#allocation5 + $0x100] sm:$0xff]  ;;  %v492_v61 = vld [vmem:[#allocation5 + $0x110] sm:$0xff] }
  0x79   : > { %1102 = vmatpush1.bf16.msra.mxu1 %v1101_v28  ;;  %v1123_v59 = vpack.c.bf16 %v493_v57, %v491_v56  ;;  %v495_v62 = vld [vmem:[#allocation5 + $0x128] sm:$0xff]  ;;  %v497_v63 = vld [vmem:[#allocation5 + $0x138] sm:$0xff]  ;;  %v1125_v0 = vpack.c.bf16 %v492_v61, %v490_v60  ;;  %v494_v2 = vld [vmem:[#allocation5 + $0x120] sm:$0xff]  ;;  %v1774_v49 = vsub.s32 0, %v1771_v48  ;;  %p1455_p13 = pnand %p1454_p1, %p1448_p5 }
  0x7a   : > { %1104 = vmatprep.subr.bf16.mxu1 %v1103_v29  ;;  %v1127_v1 = vpack.c.bf16 %v497_v63, %v495_v62  ;;  %v496_v3 = vld [vmem:[#allocation5 + $0x130] sm:$0xff]  ;;  %v499_v4 = vld [vmem:[#allocation5 + $0x148] sm:$0xff]  ;;  %v501_v5 = vld [vmem:[#allocation5 + $0x158] sm:$0xff] }
  0x7b   : > { %v1129_v6 = vpack.c.bf16 %v496_v3, %v494_v2  ;;  %v1131_v7 = vpack.c.bf16 %v501_v5, %v499_v4  ;;  %v498_v9 = vld [vmem:[#allocation5 + $0x140] sm:$0xff]  ;;  %v500_v10 = vld [vmem:[#allocation5 + $0x150] sm:$0xff]  ;;  %v503_v11 = vld [vmem:[#allocation5 + $0x168] sm:$0xff] }
  0x7c   : > { %v505_v12 = vld [vmem:[#allocation5 + $0x178] sm:$0xff]  ;;  %v1133_v13 = vpack.c.bf16 %v500_v10, %v498_v9  ;;  %v502_v15 = vld [vmem:[#allocation5 + $0x160] sm:$0xff]  ;;  %v504_v16 = vld [vmem:[#allocation5 + $0x170] sm:$0xff] }
  0x7d   : > { %1106 = vmatpush1.bf16.msra.mxu1 %v1105_v34  ;;  %v1135_v14 = vpack.c.bf16 %v505_v12, %v503_v11  ;;  %v507_v17 = vld [vmem:[#allocation5 + $0x188] sm:$0xff]  ;;  %v509_v18 = vld [vmem:[#allocation5 + $0x198] sm:$0xff]  ;;  %v1137_v19 = vpack.c.bf16 %v504_v16, %v502_v15  ;;  %v506_v21 = vld [vmem:[#allocation5 + $0x180] sm:$0xff] }
  0x7e   : > { %1108 = vmatprep.subr.bf16.mxu1 %v1107_v35  ;;  %v1139_v20 = vpack.c.bf16 %v509_v18, %v507_v17  ;;  %v508_v22 = vld [vmem:[#allocation5 + $0x190] sm:$0xff]  ;;  %v511_v23 = vld [vmem:[#allocation5 + $0x1a8] sm:$0xff]  ;;  %v513_v24 = vld [vmem:[#allocation5 + $0x1b8] sm:$0xff] }
  0x7f   : > { %v1141_v25 = vpack.c.bf16 %v508_v22, %v506_v21  ;;  %v1143_v26 = vpack.c.bf16 %v513_v24, %v511_v23  ;;  %v510_v27 = vld [vmem:[#allocation5 + $0x1a0] sm:$0xff]  ;;  %v512_v28 = vld [vmem:[#allocation5 + $0x1b0] sm:$0xff]  ;;  %v515_v29 = vld [vmem:[#allocation5 + $0x1c8] sm:$0xff] }
  0x80   : > { %v517_v30 = vld [vmem:[#allocation5 + $0x1d8] sm:$0xff]  ;;  %v1145_v31 = vpack.c.bf16 %v512_v28, %v510_v27  ;;  %v514_v33 = vld [vmem:[#allocation5 + $0x1c0] sm:$0xff]  ;;  %v516_v34 = vld [vmem:[#allocation5 + $0x1d0] sm:$0xff] }
  0x81   : > { %1110 = vmatpush1.bf16.msra.mxu1 %v1109_v40  ;;  %v1147_v32 = vpack.c.bf16 %v517_v30, %v515_v29  ;;  %v519_v35 = vld [vmem:[#allocation5 + $0x1e8] sm:$0xff]  ;;  %v521_v36 = vld [vmem:[#allocation5 + $0x1f8] sm:$0xff]  ;;  %v1149_v37 = vpack.c.bf16 %v516_v34, %v514_v33  ;;  %v372_v40 = vand.u32 127, %v371_v39  ;;  %v518_v43 = vld [vmem:[#allocation5 + $0x1e0] sm:$0xff] }
  0x82   : > { %1112 = vmatprep.subr.bf16.mxu1 %v1111_v41  ;;  %v1151_v38 = vpack.c.bf16 %v521_v36, %v519_v35  ;;  %v520_v44 = vld [vmem:[#allocation5 + $0x1f0] sm:$0xff]  ;;  %v522_v50 = vld [vmem:[%s1878_s3] sm:$0x3]  ;;  %v653_v60 = vld [vmem:[#allocation7 + $0x8] sm:$0xff] }
  0x83   : > { %v1153_v45 = vpack.c.bf16 %v520_v44, %v518_v43  ;;  %v527_v51 = vrot.slane %v522_v50, %v1774_v49  ;;  %v657_v61 = vld [vmem:[#allocation7 + $0x28] sm:$0xff]  ;;  %v655_v62 = vld [vmem:[#allocation7 + $0x18] sm:$0xff]  ;;  %v656_v2 = vld [vmem:[#allocation7 + $0x20] sm:$0xff] }
  0x84   : > { %v1155_v63 = vpack.c.bf16 %v657_v61, %v653_v60  ;;  %v654_v5 = vld [vmem:[#allocation7 + $0x10] sm:$0xff]  ;;  %v665_v10 = vld [vmem:[#allocation7 + $0x68] sm:$0xff]  ;;  %v663_v11 = vld [vmem:[#allocation7 + $0x58] sm:$0xff] }
  0x85   : > { %1114 = vmatpush1.bf16.msra.mxu1 %v1113_v46  ;;  %v667_v12 = vld [vmem:[#allocation7 + $0x78] sm:$0xff]  ;;  %v660_v15 = vld [vmem:[#allocation7 + $0x40] sm:$0xff]  ;;  %v662_v17 = vld [vmem:[#allocation7 + $0x50] sm:$0xff] }
  0x86   : > { %1116 = vmatprep.subr.bf16.mxu1 %v1115_v47  ;;  %1156 = vmatprep.subr.bf16.mxu0 %v1155_v63  ;;  %v664_v16 = vld [vmem:[#allocation7 + $0x60] sm:$0xff]  ;;  %v673_v21 = vld [vmem:[#allocation7 + $0xa8] sm:$0xff]  ;;  %v671_v24 = vld [vmem:[#allocation7 + $0x98] sm:$0xff] }
  0x87   : > { %v1161_v18 = vpack.c.bf16 %v664_v16, %v660_v15  ;;  %v672_v28 = vld [vmem:[#allocation7 + $0xa0] sm:$0xff]  ;;  %v670_v29 = vld [vmem:[#allocation7 + $0x90] sm:$0xff]  ;;  %v681_v33 = vld [vmem:[#allocation7 + $0xe8] sm:$0xff] }
  0x88   : > { %v674_v30 = vld [vmem:[#allocation7 + $0xb0] sm:$0xff]  ;;  %v679_v34 = vld [vmem:[#allocation7 + $0xd8] sm:$0xff]  ;;  %v680_v39 = vld [vmem:[#allocation7 + $0xe0] sm:$0xff] }
  0x89   : > { %1118 = vmatpush1.bf16.msra.mxu1 %v1117_v52  ;;  %v1229_v35 = vpack.c.bf16 %v674_v30, %v670_v29  ;;  %v685_v43 = vld [vmem:[#allocation7 + $0x108] sm:$0xff]  ;;  %v690_v60 = vld [vmem:[#allocation7 + $0x130] sm:$0xff]  ;;  %v695_v63 = vld [vmem:[#allocation7 + $0x158] sm:$0xff] }
  0x8a   : > { %1120 = vmatprep.subr.bf16.mxu1 %v1119_v53  ;;  %v689_v44 = vld [vmem:[#allocation7 + $0x128] sm:$0xff]  ;;  %v708_v29 = vld [vmem:[#allocation7 + $0x1c0] sm:$0xff] }
  0x8b   : > { %v693_v61 = vld [vmem:[#allocation7 + $0x148] sm:$0xff]  ;;  %v712_v30 = vld [vmem:[#allocation7 + $0x1e0] sm:$0xff] }
  0x8d   : > { %1122 = vmatpush1.bf16.msra.mxu1 %v1121_v58 }
  0x8e   : > { %1124 = vmatprep.subr.bf16.mxu1 %v1123_v59 }
  0x91   : > { %1126 = vmatpush1.bf16.msra.mxu1 %v1125_v0  ;;  %v659_v0 = vld [vmem:[#allocation7 + $0x38] sm:$0xff] }
  0x92   : > { %1128 = vmatprep.subr.bf16.mxu1 %v1127_v1  ;;  %v652_v1 = vld [vmem:[#allocation7] sm:$0xff]  ;;  %v1219_v3 = vpack.c.bf16 %v659_v0, %v655_v62  ;;  %v697_v62 = vld [vmem:[#allocation7 + $0x168] sm:$0xff]  ;;  %v699_v0 = vld [vmem:[#allocation7 + $0x178] sm:$0xff] }
  0x93   : > { %v1157_v4 = vpack.c.bf16 %v656_v2, %v652_v1 }
  0x95   : > { %1130 = vmatpush1.bf16.msra.mxu1 %v1129_v6  ;;  %v658_v6 = vld [vmem:[#allocation7 + $0x30] sm:$0xff] }
  0x96   : > { %1132 = vmatprep.subr.bf16.mxu1 %v1131_v7  ;;  %v661_v7 = vld [vmem:[#allocation7 + $0x48] sm:$0xff]  ;;  %v1221_v9 = vpack.c.bf16 %v658_v6, %v654_v5  ;;  %v696_v5 = vld [vmem:[#allocation7 + $0x160] sm:$0xff]  ;;  %v694_v6 = vld [vmem:[#allocation7 + $0x150] sm:$0xff] }
  0x99   : > { %1134 = vmatpush1.bf16.msra.mxu1 %v1133_v13  ;;  %v1159_v13 = vpack.c.bf16 %v665_v10, %v661_v7  ;;  %v1239_v7 = vpack.c.bf16 %v699_v0, %v695_v63  ;;  %v701_v10 = vld [vmem:[#allocation7 + $0x188] sm:$0xff]  ;;  %v730_v63 = vld [vmem:[#allocation7 + $0x270] sm:$0xff] }
  0x9a   : > { %1136 = vmatprep.subr.bf16.mxu1 %v1135_v14  ;;  %v1223_v14 = vpack.c.bf16 %v667_v12, %v663_v11  ;;  %v705_v11 = vld [vmem:[#allocation7 + $0x1a8] sm:$0xff]  ;;  %v703_v12 = vld [vmem:[#allocation7 + $0x198] sm:$0xff] }
  0x9b   : > { %v1179_v16 = vpack.c.bf16 %v705_v11, %v701_v10  ;;  %v733_v0 = vld [vmem:[#allocation7 + $0x288] sm:$0xff]  ;;  %v734_v11 = vld [vmem:[#allocation7 + $0x290] sm:$0xff] }
  0x9d   : > { %1138 = vmatpush1.bf16.msra.mxu1 %v1137_v19  ;;  %v666_v19 = vld [vmem:[#allocation7 + $0x70] sm:$0xff] }
  0x9e   : > { %1140 = vmatprep.subr.bf16.mxu1 %v1139_v20  ;;  %v669_v20 = vld [vmem:[#allocation7 + $0x88] sm:$0xff]  ;;  %v1225_v22 = vpack.c.bf16 %v666_v19, %v662_v17  ;;  %v700_v17 = vld [vmem:[#allocation7 + $0x180] sm:$0xff]  ;;  %v702_v19 = vld [vmem:[#allocation7 + $0x190] sm:$0xff] }
  0x9f   : > { %v1163_v23 = vpack.c.bf16 %v673_v21, %v669_v20  ;;  %v706_v21 = vld [vmem:[#allocation7 + $0x1b0] sm:$0xff] }
  0xa1   : > { %1142 = vmatpush1.bf16.msra.mxu1 %v1141_v25  ;;  %v675_v25 = vld [vmem:[#allocation7 + $0xb8] sm:$0xff] }
  0xa2   : > { %1144 = vmatprep.subr.bf16.mxu1 %v1143_v26  ;;  %v668_v26 = vld [vmem:[#allocation7 + $0x80] sm:$0xff]  ;;  %v1227_v27 = vpack.c.bf16 %v675_v25, %v671_v24  ;;  %v711_v24 = vld [vmem:[#allocation7 + $0x1d8] sm:$0xff] }
  0xa3   : > { %v715_v25 = vld [vmem:[#allocation7 + $0x1f8] sm:$0xff] }
  0xa5   : > { %1146 = vmatpush1.bf16.msra.mxu1 %v1145_v31  ;;  %v1165_v31 = vpack.c.bf16 %v672_v28, %v668_v26 }
  0xa6   : > { %1148 = vmatprep.subr.bf16.mxu1 %v1147_v32  ;;  %v677_v32 = vld [vmem:[#allocation7 + $0xc8] sm:$0xff] }
  0xa7   : > { %v1167_v36 = vpack.c.bf16 %v681_v33, %v677_v32  ;;  %v1247_v32 = vpack.c.bf16 %v715_v25, %v711_v24  ;;  %v714_v33 = vld [vmem:[#allocation7 + $0x1f0] sm:$0xff]  ;;  %v743_v24 = vld [vmem:[#allocation7 + $0x2d8] sm:$0xff] }
  0xa9   : > { %1150 = vmatpush1.bf16.msra.mxu1 %v1149_v37  ;;  %v683_v37 = vld [vmem:[#allocation7 + $0xf8] sm:$0xff] }
  0xaa   : > { %1152 = vmatprep.subr.bf16.mxu1 %v1151_v38  ;;  %v676_v38 = vld [vmem:[#allocation7 + $0xc0] sm:$0xff] }
  0xad   : > { %1154 = vmatpush1.bf16.msra.mxu1 %v1153_v45  ;;  %v687_v45 = vld [vmem:[#allocation7 + $0x118] sm:$0xff] }
  0xae   : > { %1220 = vmatprep.subr.bf16.mxu1 %v1219_v3  ;;  %v1175_v3 = vpack.c.bf16 %v697_v62, %v693_v61  ;;  %v726_v61 = vld [vmem:[#allocation7 + $0x250] sm:$0xff] }
  0xf1   : > { %v375_v41 = vpop.permute.xlu0 %374 }
  0xf2   : > { %vm376_vm1 = vcmp.eq.s32.totalorder %v372_v40, %v375_v41  ;;  %v1231_v40 = vpack.c.bf16 %v683_v37, %v679_v34  ;;  %v678_v41 = vld [vmem:[#allocation7 + $0xd0] sm:$0xff]  ;;  %v717_v34 = vld [vmem:[#allocation7 + $0x208] sm:$0xff]  ;;  %v723_v37 = vld [vmem:[#allocation7 + $0x238] sm:$0xff] }
  0xf3   : > { %v1078_v42 = vsel %vm376_vm1, 1.0, %v1525_v8  ;;  %v1780_v8 = vsub.s32 1, %v1771_v48 }
  0xf4   : > { %1079 = vmatmul.mubr.msk.f32.vlgmr.msra.gmra.mrb[0].mxu0 %vm383_vm0, %v1078_v42  ;;  %v682_v42 = vld [vmem:[#allocation7 + $0xf0] sm:$0xff] }
  0xf5   : > { %v531_v52 = vrot.slane %v522_v50, %v1780_v8  ;;  %1158 = vmatpush1.bf16.msra.mxu0 %v1157_v4  ;;  %v1233_v50 = vpack.c.bf16 %v682_v42, %v678_v41  ;;  %v692_v4 = vld [vmem:[#allocation7 + $0x140] sm:$0xff] }
  0xf6   : > { %1160 = vmatprep.subr.bf16.mxu0 %v1159_v13  ;;  %v707_v13 = vld [vmem:[#allocation7 + $0x1b8] sm:$0xff]  ;;  %v716_v41 = vld [vmem:[#allocation7 + $0x200] sm:$0xff] }
  0xf7   : > { %v1243_v20 = vpack.c.bf16 %v707_v13, %v703_v12  ;;  %v720_v42 = vld [vmem:[#allocation7 + $0x220] sm:$0xff]  ;;  %v738_v12 = vld [vmem:[#allocation7 + $0x2b0] sm:$0xff] }
  0xf9   : > { %1162 = vmatpush1.bf16.msra.mxu0 %v1161_v18  ;;  %v704_v18 = vld [vmem:[#allocation7 + $0x1a0] sm:$0xff] }
  0xfa   : > { %1164 = vmatprep.subr.bf16.mxu0 %v1163_v23  ;;  %v713_v23 = vld [vmem:[#allocation7 + $0x1e8] sm:$0xff]  ;;  %v1181_v26 = vpack.c.bf16 %v704_v18, %v700_v17 }
  0xfd   : > { %1166 = vmatpush1.bf16.msra.mxu0 %v1165_v31  ;;  %v710_v31 = vld [vmem:[#allocation7 + $0x1d0] sm:$0xff] }
  0xfe   : > { %1168 = vmatprep.subr.bf16.mxu0 %v1167_v36  ;;  %v719_v36 = vld [vmem:[#allocation7 + $0x218] sm:$0xff] }
 0x1c7   : > { %v453_v46 = vpop.f32.mrb[0].mxu0 }
 0x1c8   : > { %v455_v47 = vpop.f32.mrb[1].mxu0 }
 0x1c9   : > { %598 = vmatprep.mubr.f32.mxu1 %v455_v47  ;;  %v1169_v47 = vpack.c.bf16 %v680_v39, %v676_v38  ;;  %v1185_v38 = vpack.c.bf16 %v712_v30, %v708_v29  ;;  %v1249_v39 = vpack.c.bf16 %v714_v33, %v710_v31  ;;  %v749_v30 = vld [vmem:[#allocation7 + $0x308] sm:$0xff] }
 0x1ca   : > { %599 = vmatmul.mubr.f32.vlgmr.msra.gmra.mrb[0].mxu1 %v453_v46  ;;  %v691_v46 = vld [vmem:[#allocation7 + $0x138] sm:$0xff]  ;;  %v753_v31 = vld [vmem:[#allocation7 + $0x328] sm:$0xff] }
 0x1cb   : > { %1222 = vmatpush1.bf16.msra.mxu1 %v1221_v9  ;;  %1170 = vmatpush1.bf16.msra.mxu0 %v1169_v47  ;;  %v698_v9 = vld [vmem:[#allocation7 + $0x170] sm:$0xff]  ;;  %v729_v47 = vld [vmem:[#allocation7 + $0x268] sm:$0xff]  ;;  %v1203_v33 = vpack.c.bf16 %v753_v31, %v749_v30 }
 0x1cc   : > { %1224 = vmatprep.subr.bf16.mxu1 %v1223_v14  ;;  %v1177_v14 = vpack.c.bf16 %v696_v5, %v692_v4  ;;  %v1241_v15 = vpack.c.bf16 %v698_v9, %v694_v6  ;;  %v1257_v5 = vpack.c.bf16 %v730_v63, %v726_v61  ;;  %v736_v9 = vld [vmem:[#allocation7 + $0x2a0] sm:$0xff]  ;;  %v767_v63 = vld [vmem:[#allocation7 + $0x398] sm:$0xff] }
 0x1cf   : > { %1226 = vmatpush1.bf16.msra.mxu1 %v1225_v22  ;;  %v709_v22 = vld [vmem:[#allocation7 + $0x1c8] sm:$0xff] }
 0x1d0   : > { %1228 = vmatprep.subr.bf16.mxu1 %v1227_v27  ;;  %v1245_v27 = vpack.c.bf16 %v706_v21, %v702_v19  ;;  %v1183_v28 = vpack.c.bf16 %v713_v23, %v709_v22  ;;  %v741_v22 = vld [vmem:[#allocation7 + $0x2c8] sm:$0xff] }
 0x1d1   : > { %v745_v23 = vld [vmem:[#allocation7 + $0x2e8] sm:$0xff] }
 0x1d2   : > { %v1199_v25 = vpack.c.bf16 %v745_v23, %v741_v22 }
 0x1d3   : > { %1230 = vmatpush1.bf16.msra.mxu1 %v1229_v35  ;;  %v721_v35 = vld [vmem:[#allocation7 + $0x228] sm:$0xff] }
 0x1d4   : > { %1232 = vmatprep.subr.bf16.mxu1 %v1231_v40  ;;  %v1187_v40 = vpack.c.bf16 %v721_v35, %v717_v34  ;;  %v755_v34 = vld [vmem:[#allocation7 + $0x338] sm:$0xff]  ;;  %v748_v35 = vld [vmem:[#allocation7 + $0x300] sm:$0xff] }
 0x1d7   : > { %1234 = vmatpush1.bf16.msra.mxu1 %v1233_v50  ;;  %v727_v50 = vld [vmem:[#allocation7 + $0x258] sm:$0xff] }
 0x29d   : > { %v600_v53 = vpop.f32.mrb[0].mxu1 }
 0x29e   : > { %v1784_v54 = vadd.f32 %v600_v53, %v527_v51  ;;  %v602_v55 = vpop.f32.mrb[1].mxu1  ;;  %v1171_v51 = vpack.c.bf16 %v689_v44, %v685_v43  ;;  %v688_v53 = vld [vmem:[#allocation7 + $0x120] sm:$0xff]  ;;  %v718_v43 = vld [vmem:[#allocation7 + $0x210] sm:$0xff]  ;;  %v1251_v44 = vpack.c.bf16 %v723_v37, %v719_v36 }
 0x29f   : > { %v1786_v56 = vadd.f32 %v602_v55, %v531_v52  ;;  %v684_v52 = vld [vmem:[#allocation7 + $0x100] sm:$0xff]  ;;  %v686_v55 = vld [vmem:[#allocation7 + $0x110] sm:$0xff] }
 0x2a0   : > { %v605_v57 = vmax.f32 %v1784_v54, 0.0  ;;  %v1173_v1 = vpack.c.bf16 %v688_v53, %v684_v52  ;;  %1172 = vmatprep.subr.bf16.mxu0 %v1171_v51  ;;  %v1237_v2 = vpack.c.bf16 %v690_v60, %v686_v55  ;;  %v731_v51 = vld [vmem:[#allocation7 + $0x278] sm:$0xff]  ;;  %v1189_v52 = vpack.c.bf16 %v720_v42, %v716_v41  ;;  %v728_v60 = vld [vmem:[#allocation7 + $0x260] sm:$0xff]  ;;  %v757_v41 = vld [vmem:[#allocation7 + $0x348] sm:$0xff] }
 0x2a1   : > { %v606_v58 = vmax.f32 %v1786_v56, 0.0  ;;  %v1255_v62 = vpack.c.bf16 %v731_v51, %v727_v50  ;;  %v740_v54 = vld [vmem:[#allocation7 + $0x2c0] sm:$0xff]  ;;  %v742_v56 = vld [vmem:[#allocation7 + $0x2d0] sm:$0xff] }
 0x2a2   : > { %1174 = vmatpush1.bf16.msra.mxu0 %v1173_v1  ;;  %v737_v1 = vld [vmem:[#allocation7 + $0x2a8] sm:$0xff]  ;;  %v752_v36 = vld [vmem:[#allocation7 + $0x320] sm:$0xff] }
 0x2a3   : > { %v607_v59 = vadd.f32 %v606_v58, %v605_v57  ;;  %1176 = vmatprep.subr.bf16.mxu0 %v1175_v3  ;;  %v739_v3 = vld [vmem:[#allocation7 + $0x2b8] sm:$0xff]  ;;  %v1195_v6 = vpack.c.bf16 %v737_v1, %v733_v0  ;;  %v756_v50 = vld [vmem:[#allocation7 + $0x340] sm:$0xff] }
 0x2a4   : > { %v760_v51 = vld [vmem:[#allocation7 + $0x360] sm:$0xff]  ;;  %v771_v0 = vld [vmem:[#allocation7 + $0x3b8] sm:$0xff] }
 0x2a5   : > { %608 = vadd.xlane.f32.xlu0 %v607_v59  ;;  %v1235_v59 = vpack.c.bf16 %v691_v46, %v687_v45  ;;  %v722_v45 = vld [vmem:[#allocation7 + $0x230] sm:$0xff]  ;;  %v725_v46 = vld [vmem:[#allocation7 + $0x248] sm:$0xff]  ;;  %v764_v1 = vld [vmem:[#allocation7 + $0x380] sm:$0xff] }
 0x2a6   : > { %1178 = vmatpush1.bf16.msra.mxu0 %v1177_v14  ;;  %v1253_v53 = vpack.c.bf16 %v722_v45, %v718_v43  ;;  %v1191_v55 = vpack.c.bf16 %v729_v47, %v725_v46  ;;  %v1261_v14 = vpack.c.bf16 %v738_v12, %v734_v11  ;;  %v761_v43 = vld [vmem:[#allocation7 + $0x368] sm:$0xff]  ;;  %v763_v45 = vld [vmem:[#allocation7 + $0x378] sm:$0xff] }
 0x2a7   : > { %1236 = vmatprep.subr.bf16.mxu1 %v1235_v59  ;;  %1180 = vmatprep.subr.bf16.mxu0 %v1179_v16  ;;  %v724_v59 = vld [vmem:[#allocation7 + $0x240] sm:$0xff]  ;;  %v1207_v46 = vpack.c.bf16 %v761_v43, %v757_v41 }
 0x2a8   : > { %1238 = vmatpush1.bf16.msra.mxu1 %v1237_v2  ;;  %v735_v2 = vld [vmem:[#allocation7 + $0x298] sm:$0xff]  ;;  %v1193_v4 = vpack.c.bf16 %v728_v60, %v724_v59  ;;  %v765_v59 = vld [vmem:[#allocation7 + $0x388] sm:$0xff] }
 0x2a9   : > { %1240 = vmatprep.subr.bf16.mxu1 %v1239_v7  ;;  %v732_v7 = vld [vmem:[#allocation7 + $0x280] sm:$0xff]  ;;  %v1259_v10 = vpack.c.bf16 %v739_v3, %v735_v2  ;;  %v769_v60 = vld [vmem:[#allocation7 + $0x3a8] sm:$0xff]  ;;  %v1275_v2 = vpack.c.bf16 %v771_v0, %v767_v63 }
 0x2aa   : > { %1182 = vmatpush1.bf16.msra.mxu0 %v1181_v26  ;;  %v1197_v13 = vpack.c.bf16 %v736_v9, %v732_v7  ;;  %v747_v26 = vld [vmem:[#allocation7 + $0x2f8] sm:$0xff]  ;;  %v768_v3 = vld [vmem:[#allocation7 + $0x3a0] sm:$0xff]  ;;  %v773_v7 = vld [vmem:[#allocation7 + $0x3c8] sm:$0xff] }
 0x2ab   : > { %1184 = vmatprep.subr.bf16.mxu0 %v1183_v28  ;;  %v777_v9 = vld [vmem:[#allocation7 + $0x3e8] sm:$0xff] }
 0x2ac   : > { %1242 = vmatpush1.bf16.msra.mxu1 %v1241_v15  ;;  %v1215_v12 = vpack.c.bf16 %v777_v9, %v773_v7 }
 0x2ad   : > { %1244 = vmatprep.subr.bf16.mxu1 %v1243_v20 }
 0x2ae   : > { %1186 = vmatpush1.bf16.msra.mxu0 %v1185_v38  ;;  %v1205_v38 = vpack.c.bf16 %v752_v36, %v748_v35  ;;  %v792_v35 = vsub.s32 2, %v1771_v48  ;;  %v796_v36 = vsub.s32 3, %v1771_v48 }
 0x2af   : > { %1188 = vmatprep.subr.bf16.mxu0 %v1187_v40  ;;  %v754_v40 = vld [vmem:[#allocation7 + $0x330] sm:$0xff] }
 0x2b0   : > { %1246 = vmatpush1.bf16.msra.mxu1 %v1245_v27  ;;  %v1263_v27 = vpack.c.bf16 %v747_v26, %v743_v24  ;;  %v624_v26 = vld [vmem:[%s1879_s4] sm:$0x3] }
 0x2b1   : > { %1248 = vmatprep.subr.bf16.mxu1 %v1247_v32  ;;  %v751_v32 = vld [vmem:[#allocation7 + $0x318] sm:$0xff] }
 0x2b2   : > { %1190 = vmatpush1.bf16.msra.mxu0 %v1189_v52  ;;  %v1267_v37 = vpack.c.bf16 %v755_v34, %v751_v32  ;;  %v758_v52 = vld [vmem:[#allocation7 + $0x350] sm:$0xff] }
 0x2b3   : > { %1192 = vmatprep.subr.bf16.mxu0 %v1191_v55  ;;  %v762_v55 = vld [vmem:[#allocation7 + $0x370] sm:$0xff] }
 0x2b4   : > { %1250 = vmatpush1.bf16.msra.mxu1 %v1249_v39  ;;  %v750_v39 = vld [vmem:[#allocation7 + $0x310] sm:$0xff]  ;;  %v1273_v61 = vpack.c.bf16 %v762_v55, %v758_v52 }
 0x2b5   : > { %1252 = vmatprep.subr.bf16.mxu1 %v1251_v44  ;;  %v1269_v42 = vpack.c.bf16 %v754_v40, %v750_v39  ;;  %v759_v44 = vld [vmem:[#allocation7 + $0x358] sm:$0xff] }
 0x2b6   : > { %1194 = vmatpush1.bf16.msra.mxu0 %v1193_v4  ;;  %v1271_v47 = vpack.c.bf16 %v763_v45, %v759_v44  ;;  %v766_v4 = vld [vmem:[#allocation7 + $0x390] sm:$0xff] }
 0x2b7   : > { %1196 = vmatprep.subr.bf16.mxu0 %v1195_v6  ;;  %v1213_v6 = vpack.c.bf16 %v768_v3, %v764_v1 }
 0x2b8   : > { %1254 = vmatpush1.bf16.msra.mxu1 %v1253_v53  ;;  %v1209_v53 = vpack.c.bf16 %v760_v51, %v756_v50 }
 0x2b9   : > { %1256 = vmatprep.subr.bf16.mxu1 %v1255_v62  ;;  %v1211_v62 = vpack.c.bf16 %v769_v60, %v765_v59 }
 0x2ba   : > { %1198 = vmatpush1.bf16.msra.mxu0 %v1197_v13  ;;  %v779_v13 = vld [vmem:[#allocation7 + $0x3f8] sm:$0xff] }
 0x2bb   : > { %1200 = vmatprep.subr.bf16.mxu0 %v1199_v25 }
 0x2bc   : > { %1258 = vmatpush1.bf16.msra.mxu1 %v1257_v5  ;;  %v770_v5 = vld [vmem:[#allocation7 + $0x3b0] sm:$0xff] }
 0x2bd   : > { %1260 = vmatprep.subr.bf16.mxu1 %v1259_v10  ;;  %v775_v10 = vld [vmem:[#allocation7 + $0x3d8] sm:$0xff]  ;;  %v1277_v11 = vpack.c.bf16 %v770_v5, %v766_v4 }
 0x2c0   : > { %1262 = vmatpush1.bf16.msra.mxu1 %v1261_v14  ;;  %v772_v14 = vld [vmem:[#allocation7 + $0x3c0] sm:$0xff] }
 0x2c1   : > { %1264 = vmatprep.subr.bf16.mxu1 %v1263_v27  ;;  %v633_v27 = vrot.slane %v624_v26, %v1780_v8 }
 0x332   : > { %v609_v15 = vpop.xlane.xlu0 %608 }
 0x333   : > { %v611_v16 = vmul.f32 0.00390625, %v609_v15  ;;  %v776_v15 = vld [vmem:[#allocation7 + $0x3e0] sm:$0xff] }
 0x335   : > { %v1796_v17 = vsub.f32 %v605_v57, %v611_v16  ;;  %v1800_v18 = vsub.f32 %v606_v58, %v611_v16  ;;  %v744_v57 = vld [vmem:[#allocation7 + $0x2e0] sm:$0xff]  ;;  %v746_v58 = vld [vmem:[#allocation7 + $0x2f0] sm:$0xff]  ;;  %v1279_v16 = vpack.c.bf16 %v779_v13, %v775_v10 }
 0x336   : > { %v1201_v28 = vpack.c.bf16 %v744_v57, %v740_v54  ;;  %v1265_v29 = vpack.c.bf16 %v746_v58, %v742_v56  ;;  %v638_v54 = vld [vmem:[%s1880_s5] sm:$0x3]  ;;  %v629_v57 = vrot.slane %v624_v26, %v1774_v49 }
 0x337   : > { %v614_v19 = vmul.f32 %v1796_v17, %v1796_v17  ;;  %v615_v20 = vmul.f32 %v1800_v18, %v1800_v18  ;;  %v643_v58 = vrot.slane %v638_v54, %v1774_v49 }
 0x338   : > { %1202 = vmatpush1.bf16.msra.mxu0 %v1201_v28  ;;  %1266 = vmatpush1.bf16.msra.mxu1 %v1265_v29  ;;  %v647_v29 = vrot.slane %v638_v54, %v1780_v8 }
 0x339   : > { %v616_v21 = vadd.f32 %v615_v20, %v614_v19  ;;  %1204 = vmatprep.subr.bf16.mxu0 %v1203_v33  ;;  %1268 = vmatprep.subr.bf16.mxu1 %v1267_v37  ;;  %v774_v19 = vld [vmem:[#allocation7 + $0x3d0] sm:$0xff] }
 0x33a   : > { %v778_v20 = vld [vmem:[#allocation7 + $0x3f0] sm:$0xff] }
 0x33b   : > { %617 = vadd.xlane.f32.xlu1 %v616_v21  ;;  %v1217_v21 = vpack.c.bf16 %v776_v15, %v772_v14  ;;  %v1281_v22 = vpack.c.bf16 %v778_v20, %v774_v19 }
 0x33c   : > { %1206 = vmatpush1.bf16.msra.mxu0 %v1205_v38  ;;  %1270 = vmatpush1.bf16.msra.mxu1 %v1269_v42 }
 0x33d   : > { %1208 = vmatprep.subr.bf16.mxu0 %v1207_v46  ;;  %1272 = vmatprep.subr.bf16.mxu1 %v1271_v47 }
 0x340   : > { %1210 = vmatpush1.bf16.msra.mxu0 %v1209_v53  ;;  %1274 = vmatpush1.bf16.msra.mxu1 %v1273_v61 }
 0x341   : > { %1212 = vmatprep.subr.bf16.mxu0 %v1211_v62  ;;  %1276 = vmatprep.subr.bf16.mxu1 %v1275_v2 }
 0x344   : > { %1214 = vmatpush1.bf16.msra.mxu0 %v1213_v6  ;;  %1278 = vmatpush1.bf16.msra.mxu1 %v1277_v11 }
 0x345   : > { %1216 = vmatprep.subr.bf16.mxu0 %v1215_v12  ;;  %1280 = vmatprep.subr.bf16.mxu1 %v1279_v16 }
 0x348   : > { %1218 = vmatpush1.bf16.msra.mxu0 %v1217_v21  ;;  %1282 = vmatpush1.bf16.msra.mxu1 %v1281_v22 }
 0x3c8   : > { %v618_v23 = vpop.xlane.xlu1 %617 }
 0x3c9   : > { %v619_v24 = vmul.f32 0.00390625, %v618_v23 }
 0x3cb   : > { %v620_v25 = vadd.f32 1e-05, %v619_v24 }
 0x3cd   : > { %1357 = vrsqrt.f32 %v620_v25 }
 0x3d7   : > { %v1358_v28 = vpop.eup %1357 }
 0x3d8   : > { %v623_v56 = vmul.f32 %v1358_v28, %v1800_v18  ;;  %v622_v30 = vmul.f32 %v1358_v28, %v1796_v17  ;;  %v780_v18 = vld [vmem:[%s1882_s7] sm:$0xf] }
 0x3d9   : > { %v785_v17 = vrot.slane %v780_v18, %v1774_v49  ;;  %v793_v37 = vrot.slane %v780_v18, %v792_v35  ;;  %v789_v38 = vrot.slane %v780_v18, %v1780_v8  ;;  %v797_v39 = vrot.slane %v780_v18, %v796_v36 }
 0x3da   : > { %v637_v31 = vmul.f32 %v633_v27, %v623_v56  ;;  %v636_v32 = vmul.f32 %v629_v57, %v622_v30 }
 0x3dc   : > { %v651_v33 = vadd.f32 %v647_v29, %v637_v31  ;;  %v650_v34 = vadd.f32 %v643_v58, %v636_v32 }
 0x3de   : > { %866 = vmatprep.mubr.f32.mxu0 %v651_v33  ;;  %937 = vmatprep.mubr.f32.mxu1 %v651_v33 }
 0x3df   : > { %867 = vmatmul.mubr.f32.vlgmr.msra.gmra.mrb[2].mxu0 %v650_v34  ;;  %938 = vmatmul.mubr.f32.vlgmr.msra.gmra.mrb[2].mxu1 %v650_v34 }
 0x4b2   : > { %v868_v40 = vpop.f32.mrb[2].mxu0  ;;  %v939_v41 = vpop.f32.mrb[2].mxu1 }
 0x4b3   : > { %v869_v42 = vadd.f32 %v868_v40, %v785_v17  ;;  %v940_v43 = vadd.f32 %v939_v41, %v793_v37  ;;  %v870_v44 = vpop.f32.mrb[3].mxu0  ;;  %v941_v45 = vpop.f32.mrb[3].mxu1 }
 0x4b4   : > { %v871_v46 = vadd.f32 %v870_v44, %v789_v38  ;;  %v942_v48 = vadd.f32 %v941_v45, %v797_v39 }
 0x4b5   : > { %944 = vst [vmem:[%s365_s23] sm:$0xff] %v869_v42  ;;  %946 = vst [vmem:[%s365_s23 + $0x10] sm:$0xff] %v940_v43 }
 0x4b6   : > { %945 = vst [vmem:[%s365_s23 + $0x8] sm:$0xff] %v871_v46  ;;  %947 = vst [vmem:[%s365_s23 + $0x18] sm:$0xff] %v942_v48 }
 0x4b7   : > { %1458 = shalt.err (!%p1455_p13)
}
 0x4b8   : > { %s1459_s21 = scalar_lea.hbm %s1831_s14, 512  ;;  %s1463_s20 = scalar_lea.hbm %s1883_s8, 1024 }
 0x4b9   : > { %p1460_p6 = scmp.ne.s32.totalorder %s1831_s14, %s1459_s21  ;;  %p1464_p7 = scmp.lt.u32.totalorder %s1831_s14, %s1883_s8 }
 0x4ba   : > { %p1465_p8 = scmp.lt.u32.totalorder %s1463_s20, %s1459_s21  ;;  %p1467_p0 = scmp.lt.u32.totalorder %s1459_s21, %s1831_s14 }
 0x4bb   : > { %p1461_p10 = pnand %p1460_p6, %p1901_p2 }
 0x4bc   : > { %p1466_p11 = por %p1465_p8, %p1464_p7 }
 0x4bd   : > { %p1462_p4 = pneg %p1461_p10 }
 0x4be   : > { %p1468_p3 = por %p1467_p0, %p1466_p11 }
 0x4c0   : > { %p1469_p5 = pnand %p1468_p3, %p1462_p4 }
 0x4c2   : > { %1472 = shalt.err (!%p1469_p5)
}
 0x4c3   : > { %1293 = dma.vmem_to_hbm [thread:$0]  (%p1901_p2), %s1833_s18, 512, %s1831_s14, %s949_s9  }
 0x4c4 PF: > { %s975_s19 = sand.u32 1, %s1503_s27   ;;  %p1902_p9 = scmp.ne.s32.totalorder %s1890_s12, 0 }
 0x4c5   : > { %p1903_p12 = scmp.ge.s32.totalorder %s1515_s30, 2  ;;  %s976_s16 = scalar_lea.sflag [#allocation4], %s975_s19 }
 0x4c7   : > { %p1307_p1 = pnand %p1903_p12, %p1902_p9 }
 0x4c9   : > { %1498 = dma.done.wait (!%p1307_p1), %s976_s16, 512  }
 0x4ca   : > { %1500 = vsyncadd (!%p1307_p1), %s976_s16, 4294966784  ;;  %p22_p13 = scmp.ge.s32.totalorder %s1685_s22, 4   ;;  %s1904_s27 = smov %s1507_s28 }
 0x4cb   : > { %s1905_s28 = smov %s1511_s29  ;;  %s1906_s29 = smov %s1694_s25 }
 0x4cc   : > { %s1907_s30 = smov %s1685_s22  ;;  %24 = sbr.rel (!%p22_p13) target bundleno = 6 (0x6), region = 108 }
 0x4d3   :  { %981 = vsyncpa [#allocation3], 1 }
 0x4d4   :  { %983 = vsyncpa [#allocation3 + $0x1], 1 }
 0x4d5   :  { %984 = vsyncpa [#allocation6], 1 }
 0x4d6   :  { %985 = vsyncpa [#allocation4], 1 }
 0x4d7   :  { %987 = vsyncpa [#allocation4 + $0x1], 1 }

</bundles_post_ra>
